<compile_context>
chip_gen: v7x
topology: tpu7x:2x2x1
jax: 0.10.0
libtpu: 0.0.40
codegen_flags: <defaults>
</compile_context>

<pallas_src>
import jax
import jax.numpy as jnp
import numpy as np
from jax.experimental import pallas as pl
from jax.experimental.pallas import tpu as pltpu


# ----------------------------------------------------------------------------
# Host-side structured-matrix construction (built once per parameter set)
# ----------------------------------------------------------------------------
def _bilinear_matrix(in_size, out_size):
    # nn.UpsamplingBilinear2d == F.interpolate(mode="bilinear", align_corners=True)
    src = jnp.arange(out_size, dtype=jnp.float32) * (in_size - 1) / max(out_size - 1, 1)
    lo = jnp.clip(jnp.floor(src).astype(jnp.int32), 0, max(in_size - 2, 0))
    frac = src - lo.astype(jnp.float32)
    rows = jnp.arange(out_size)
    U = jnp.zeros((out_size, in_size), jnp.float32)
    U = U.at[rows, lo].add(1.0 - frac)
    U = U.at[rows, jnp.minimum(lo + 1, in_size - 1)].add(frac)
    return U


def _conv3_row_taps(w, Wo):
    # w: (3, 3, Cin, Cout) HWIO.  Pre-sum the kw taps:
    #   M[kh] = sum_kw kron(col_shift(1 - kw), w[kh, kw])  -> (3, Wo*Cin, Wo*Cout)
    Cin, Cout = w.shape[2], w.shape[3]
    taps = []
    for kh in range(3):
        m = jnp.zeros((Wo * Cin, Wo * Cout), jnp.float32)
        for kw in range(3):
            m = m + jnp.kron(jnp.eye(Wo, k=1 - kw, dtype=jnp.float32), w[kh, kw])
        taps.append(m)
    return jnp.stack(taps)


def precompute_gblockup_operands(params, N, H, W, batch_block=None):
    """Build every structured operand once per parameter set (hoisted off the
    per-call path).  Returns a dict of device arrays + static layout metadata."""
    (w1, b1, w31, b31, w32, b32, scale, shift) = params
    Cin, Cout = w1.shape
    Ho, Wo = 2 * H, 2 * W

    if batch_block is None:
        # Largest divisor Nb of N such that:
        #   - N // Nb >= 2   (>= 2 grid steps: DMA/compute overlap, v7x 2-TC sharding)
        #   - Nb * Ho <= 512 (per-step MXU M-dimension cap; buffers stay < ~1 MiB)
        batch_block = 1
        for nb in range(1, N + 1):
            if N % nb == 0 and nb * Ho <= 512 and N // nb >= 2:
                batch_block = nb
    Nb = batch_block
    assert N % Nb == 0, "batch_block must divide the batch size"

    L = W * Cin
    Lp = ((L + 127) // 128) * 128          # pad the lane axis to full 128-lane vregs

    # bilinear x2 (align_corners=True) interpolation matrices
    uh = _bilinear_matrix(H, Ho)                                    # (Ho, H)
    uw = _bilinear_matrix(W, Wo)                                    # (Wo, W)

    uwk = jnp.kron(uw.T, jnp.eye(Cin, dtype=jnp.float32))           # (L, Wo*Cin)
    k1 = jnp.kron(jnp.eye(Wo, dtype=jnp.float32), w1)               # (Wo*Cin, Wo*Cout)
    uwk1 = jnp.pad(uwk @ k1, ((0, Lp - L), (0, 0)))                 # (Lp, Wo*Cout)

    m31 = _conv3_row_taps(w31, Wo)                                  # (3, Wo*Cin, Wo*Cin)
    m32 = _conv3_row_taps(w32, Wo)                                  # (3, Wo*Cin, Wo*Cout)
    # fold the width-upsample into conv3_1's taps: um31[kh] = uwk @ m31[kh]
    um31 = jnp.pad(jnp.einsum('lk,tko->tlo', uwk, m31),
                   ((0, 0), (0, Lp - L), (0, 0)))                   # (3, Lp, Wo*Cin)
    # stack the kh taps along K so each conv is ONE K=3*Kin matmul in the kernel.
    # Row-block order [kh=0; kh=1; kh=2] matches the kernel's [v_dn | v_md | v_up].
    um31_cat = um31.reshape(3 * Lp, Wo * Cin)
    m32_cat = m32.reshape(3 * (Wo * Cin), Wo * Cout)

    # per-lane BN scale/shift and conv biases, tiled to the lane = w*Cin + c layout
    sc_in = jnp.pad(jnp.tile(scale, W), (0, Lp - L)).reshape(1, Lp)
    sf_in = jnp.pad(jnp.tile(shift, W), (0, Lp - L)).reshape(1, Lp)
    sc_out = jnp.tile(scale, Wo).reshape(1, Wo * Cin)
    sf_out = jnp.tile(shift, Wo).reshape(1, Wo * Cin)
    b1t = jnp.tile(b1, Wo).reshape(1, Wo * Cout)
    b31t = jnp.tile(b31, Wo).reshape(1, Wo * Cin)
    b32t = jnp.tile(b32, Wo).reshape(1, Wo * Cout)

    bf16 = jnp.bfloat16
    return {
        "uh": uh.astype(bf16),              # (Ho, H) per-image height upsample
        "uwk1": uwk1.astype(bf16),          # (Lp, Wo*Cout) upsample-width + 1x1 conv
        "um31": um31_cat.astype(bf16),      # (3*Lp, Wo*Cin) upsample-width + conv3_1 taps
        "m32": m32_cat.astype(bf16),        # (3*Wo*Cin, Wo*Cout) conv3_2 taps
        "sc_in": sc_in, "sf_in": sf_in, "sc_out": sc_out, "sf_out": sf_out,
        "b1": b1t, "b31": b31t, "b32": b32t,
        "Nb": Nb, "Lp": Lp, "Cin": Cin, "Cout": Cout, "H": H, "W": W,
    }


# ----------------------------------------------------------------------------
# Pallas kernel: GBlockUp forward for Nb batch elements per grid step
# ----------------------------------------------------------------------------
def _gblockup_kernel(x_ref, uh_ref, uwk1_ref, um31_ref, m32_ref,
                     sc_in_ref, sf_in_ref, sc_out_ref, sf_out_ref,
                     b1_ref, b31_ref, b32_ref, out_ref):
    bf16 = jnp.bfloat16
    Ho, H = uh_ref.shape
    rows = out_ref.shape[0]             # Nb * Ho
    Nb = rows // Ho

    x_bf = x_ref[...]                   # (Nb*H, Lp) bf16, zero-padded lanes
    uh = uh_ref[...]                    # (Ho, H)    bf16

    # Edge-row keep masks, built in-kernel (no DMA'd mask buffer):
    #   keep_dn zeroes the first row of each image, keep_up the last.
    r = jax.lax.broadcasted_iota(jnp.int32, (rows, 1), 0) % Ho
    keep_dn = (r != 0).astype(jnp.float32)
    keep_up = (r != Ho - 1).astype(jnp.float32)

    def upsample_h(v_bf):
        # Per-image height upsample (no block-diagonal kron, no zero FLOPs, bf16 MXU).
        if Nb == 1:
            return jnp.dot(uh, v_bf, preferred_element_type=jnp.float32)
        parts = [jnp.dot(uh, v_bf[n * H:(n + 1) * H, :],
                         preferred_element_type=jnp.float32)
                 for n in range(Nb)]
        return jnp.concatenate(parts, axis=0)

    def taps(v, m_ref, bias):
        # 3x3 conv: kw taps pre-summed, kh taps stacked along K on the host ->
        #   out = [shift_dn(v) | v | shift_up(v)] @ m_cat + bias
        # Row shifts are sublane rolls (XLU) with wrapped edge rows zeroed (SAME pad).
        v_dn = (pltpu.roll(v, shift=1, axis=0) * keep_dn).astype(bf16)
        v_md = v.astype(bf16)
        v_up = (pltpu.roll(v, shift=rows - 1, axis=0) * keep_up).astype(bf16)
        v_cat = jnp.concatenate([v_dn, v_md, v_up], axis=-1)        # (rows, 3*K)
        return jnp.dot(v_cat, m_ref[...],
                       preferred_element_type=jnp.float32) + bias

    # ---- branch 1: bilinear x2 upsample -> conv1 (1x1 conv folded into uwk1) ----
    t1 = upsample_h(x_bf)                                                # (rows, Lp) f32
    y1 = jnp.dot(t1.astype(bf16), uwk1_ref[...],
                 preferred_element_type=jnp.float32) + b1_ref[...]       # (rows, Wo*Cout)

    # ---- branch 2: BN -> ReLU -> upsample -> conv3_1 -> BN -> ReLU -> conv3_2 ----
    x2 = jnp.maximum(x_bf.astype(jnp.float32) * sc_in_ref[...] + sf_in_ref[...], 0.0)
    t2 = upsample_h(x2.astype(bf16))                                     # (rows, Lp) f32
    z = taps(t2, um31_ref, b31_ref[...])                                 # (rows, Wo*Cin)
    z = jnp.maximum(z * sc_out_ref[...] + sf_out_ref[...], 0.0)
    y2 = taps(z, m32_ref, b32_ref[...])                                  # (rows, Wo*Cout)

    out_ref[...] = (y1 + y2).astype(out_ref.dtype)


# ----------------------------------------------------------------------------
# Wrappers
# ----------------------------------------------------------------------------
def gblockup_pack_input(x_nchw, Lp):
    """NCHW -> packed (N*H, Lp) bf16; row = b*H + h, lane = w*Cin + c (zero-padded)."""
    N, Cin, H, W = x_nchw.shape
    x2d = jnp.transpose(x_nchw, (0, 2, 3, 1)).reshape(N * H, W * Cin)
    return jnp.pad(x2d.astype(jnp.bfloat16), ((0, 0), (0, Lp - W * Cin)))


def gblockup_unpack_output(out2d, N, Ho, Wo, Cout):
    """Packed (N*Ho, Wo*Cout) -> NCHW."""
    return out2d.reshape(N, Ho, Wo, Cout).transpose(0, 3, 1, 2)


def gblockup_apply(x2d, ops, out_dtype=jnp.float32):
    """Fused GBlockUp on the packed layout: (N*H, Lp) bf16 -> (N*Ho, Wo*Cout).
    Use this entry point directly when chaining blocks so activations stay in the
    packed layout and the NCHW relayout/pad is not paid per block."""
    H, W, Nb, Lp, Cout = ops["H"], ops["W"], ops["Nb"], ops["Lp"], ops["Cout"]
    Ho, Wo = 2 * H, 2 * W
    N = x2d.shape[0] // H
    rows_in, rows_out = Nb * H, Nb * Ho

    def const_spec(arr):
        nd = arr.ndim
        return pl.BlockSpec(arr.shape, lambda n, _nd=nd: (0,) * _nd)

    consts = (ops["uh"], ops["uwk1"], ops["um31"], ops["m32"],
              ops["sc_in"], ops["sf_in"], ops["sc_out"], ops["sf_out"],
              ops["b1"], ops["b31"], ops["b32"])

    return pl.pallas_call(
        _gblockup_kernel,
        out_shape=jax.ShapeDtypeStruct((N * Ho, Wo * Cout), out_dtype),
        grid_spec=pltpu.PrefetchScalarGridSpec(
            num_scalar_prefetch=0,
            grid=(N // Nb,),
            in_specs=[pl.BlockSpec((rows_in, Lp), lambda n: (n, 0))]
                     + [const_spec(c) for c in consts],
            out_specs=pl.BlockSpec((rows_out, Wo * Cout), lambda n: (n, 0)),
        ),
        compiler_params=pltpu.CompilerParams(
            dimension_semantics=("parallel",),
        ),
    )(x2d, *consts)


def gblockup_forward(x_nchw, ops, out_dtype=jnp.float32):
    """Convenience NCHW entry point for the demo (pack -> kernel -> unpack)."""
    N, Cin, H, W = x_nchw.shape
    Ho, Wo = 2 * H, 2 * W
    x2d = gblockup_pack_input(x_nchw, ops["Lp"])
    out2d = gblockup_apply(x2d, ops, out_dtype=out_dtype)
    return gblockup_unpack_output(out2d, N, Ho, Wo, ops["Cout"])


# ----------------------------------------------------------------------------
# Plain-JAX reference (sanity check only)
# ----------------------------------------------------------------------------
def gblockup_reference(x_nchw, params):
    (w1, b1, w31, b31, w32, b32, scale, shift) = params
    N, Cin, H, W = x_nchw.shape
    uh = _bilinear_matrix(H, 2 * H)
    uw = _bilinear_matrix(W, 2 * W)
    x = jnp.transpose(x_nchw, (0, 2, 3, 1)).astype(jnp.float32)  # NHWC

    hi = jax.lax.Precision.HIGHEST

    def up(v):
        return jnp.einsum('ph,qw,nhwc->npqc', uh, uw, v, precision=hi)

    def bn_relu(v):
        return jnp.maximum(v * scale + shift, 0.0)

    def conv3(v, w, b):
        y = jax.lax.conv_general_dilated(
            v, w, (1, 1), 'SAME',
            dimension_numbers=('NHWC', 'HWIO', 'NHWC'), precision=hi)
        return y + b

    x1 = up(x)
    x1 = jnp.einsum('npqc,cd->npqd', x1, w1, precision=hi) + b1
    x2 = bn_relu(x)
    x2 = up(x2)
    x2 = conv3(x2, w31, b31)
    x2 = bn_relu(x2)
    x2 = conv3(x2, w32, b32)
    return jnp.transpose(x1 + x2, (0, 3, 1, 2))


# ----------------------------------------------------------------------------
if __name__ == "__main__":
    N, Cin, Cout, H, W = 2, 4, 8, 16, 16
    key = jax.random.PRNGKey(0)
    ks = jax.random.split(key, 11)

    x = jax.random.normal(ks[0], (N, Cin, H, W), jnp.float32)

    # Deterministic synthetic parameters (conv weights in HWIO / (ci, co) layout).
    w1 = 0.1 * jax.random.normal(ks[1], (Cin, Cout), jnp.float32)        # conv1 (1x1)
    b1 = 0.1 * jax.random.normal(ks[2], (Cout,), jnp.float32)
    w31 = 0.1 * jax.random.normal(ks[3], (3, 3, Cin, Cin), jnp.float32)  # conv3_1
    b31 = 0.1 * jax.random.normal(ks[4], (Cin,), jnp.float32)
    w32 = 0.1 * jax.random.normal(ks[5], (3, 3, Cin, Cout), jnp.float32) # conv3_2
    b32 = 0.1 * jax.random.normal(ks[6], (Cout,), jnp.float32)

    # TODO(synk): BatchNorm is implemented in inference mode (running stats folded
    # into a per-channel scale/shift); PyTorch's default training-mode batch
    # statistics would need an additional cross-batch reduction pass.
    gamma = 1.0 + 0.1 * jax.random.normal(ks[7], (Cin,), jnp.float32)
    beta = 0.1 * jax.random.normal(ks[8], (Cin,), jnp.float32)
    running_mean = 0.1 * jax.random.normal(ks[9], (Cin,), jnp.float32)
    running_var = 1.0 + 0.1 * jnp.abs(jax.random.normal(ks[10], (Cin,), jnp.float32))
    eps = 1e-5
    scale = gamma / jnp.sqrt(running_var + eps)
    shift = beta - running_mean * scale

    params = (w1, b1, w31, b31, w32, b32, scale, shift)

    # Structured operands are built once per parameter set (hoisted off the
    # per-forward critical path).  For N=2, Ho=32 this picks Nb=1 -> grid=(2,)
    # so the pipeline double-buffers and v7x can use both TensorCores.
    ops = precompute_gblockup_operands(params, N, H, W)

    out = jax.block_until_ready(gblockup_forward(x, ops))
    ref = jax.block_until_ready(gblockup_reference(x, params))

    assert out.shape == (N, Cout, 2 * H, 2 * W), out.shape
    # bf16 input packing + bf16 MXU operands with f32 accumulation.
    np.testing.assert_allclose(np.asarray(out), np.asarray(ref), rtol=3e-2, atol=3e-2)
    print("KERNEL_OK")
</pallas_src>

<mosaic_0001>
module attributes {stable_mosaic.version = 11 : i64} {
  func.func @_gblockup_kernel(%arg0: i32, %arg1: memref<16x128xbf16, #tpu.memory_space<vmem>>, %arg2: memref<32x16xbf16, #tpu.memory_space<vmem>>, %arg3: memref<128x256xbf16, #tpu.memory_space<vmem>>, %arg4: memref<384x128xbf16, #tpu.memory_space<vmem>>, %arg5: memref<384x256xbf16, #tpu.memory_space<vmem>>, %arg6: memref<1x128xf32, #tpu.memory_space<vmem>>, %arg7: memref<1x128xf32, #tpu.memory_space<vmem>>, %arg8: memref<1x128xf32, #tpu.memory_space<vmem>>, %arg9: memref<1x128xf32, #tpu.memory_space<vmem>>, %arg10: memref<1x256xf32, #tpu.memory_space<vmem>>, %arg11: memref<1x128xf32, #tpu.memory_space<vmem>>, %arg12: memref<1x256xf32, #tpu.memory_space<vmem>>, %arg13: memref<32x256xf32, #tpu.memory_space<vmem>>) attributes {dimension_semantics = [#tpu.dimension_semantics<parallel>], iteration_bounds = array<i64: 2>, scalar_prefetch = 0 : i64, scratch_operands = 0 : i64, tpu.core_type = #tpu.core_type<tc>, window_params = [{transform_indices = @transform_0, window_bounds = array<i64: 16, 128>}, {pipeline_mode = #tpu.pipeline_mode<synchronous>, transform_indices = @transform_1, window_bounds = array<i64: 32, 16>}, {pipeline_mode = #tpu.pipeline_mode<synchronous>, transform_indices = @transform_2, window_bounds = array<i64: 128, 256>}, {pipeline_mode = #tpu.pipeline_mode<synchronous>, transform_indices = @transform_3, window_bounds = array<i64: 384, 128>}, {pipeline_mode = #tpu.pipeline_mode<synchronous>, transform_indices = @transform_4, window_bounds = array<i64: 384, 256>}, {pipeline_mode = #tpu.pipeline_mode<synchronous>, transform_indices = @transform_5, window_bounds = array<i64: 1, 128>}, {pipeline_mode = #tpu.pipeline_mode<synchronous>, transform_indices = @transform_6, window_bounds = array<i64: 1, 128>}, {pipeline_mode = #tpu.pipeline_mode<synchronous>, transform_indices = @transform_7, window_bounds = array<i64: 1, 128>}, {pipeline_mode = #tpu.pipeline_mode<synchronous>, transform_indices = @transform_8, window_bounds = array<i64: 1, 128>}, {pipeline_mode = #tpu.pipeline_mode<synchronous>, transform_indices = @transform_9, window_bounds = array<i64: 1, 256>}, {pipeline_mode = #tpu.pipeline_mode<synchronous>, transform_indices = @transform_10, window_bounds = array<i64: 1, 128>}, {pipeline_mode = #tpu.pipeline_mode<synchronous>, transform_indices = @transform_11, window_bounds = array<i64: 1, 256>}, {transform_indices = @transform_12, window_bounds = array<i64: 32, 256>}]} {
    %c0 = arith.constant 0 : index
    %c0_0 = arith.constant 0 : index
    %0 = vector.load %arg1[%c0, %c0_0] : memref<16x128xbf16, #tpu.memory_space<vmem>>, vector<16x128xbf16>
    %c0_1 = arith.constant 0 : index
    %c0_2 = arith.constant 0 : index
    %1 = vector.load %arg2[%c0_1, %c0_2] : memref<32x16xbf16, #tpu.memory_space<vmem>>, vector<32x16xbf16>
    %2 = tpu.iota {dimensions = array<i32: 0>} : vector<32x1xi32>
    %c32_i32 = arith.constant 32 : i32
    %c0_i32 = arith.constant 0 : i32
    %3 = arith.cmpi eq, %c32_i32, %c0_i32 : i32
    %c1_i32 = arith.constant 1 : i32
    %4 = arith.select %3, %c1_i32, %c32_i32 : i32
    %5 = vector.broadcast %4 : i32 to vector<32x1xi32>
    %6 = arith.remsi %2, %5 : vector<32x1xi32>
    %c0_i32_3 = arith.constant 0 : i32
    %7 = vector.broadcast %c0_i32_3 : i32 to vector<32x1xi32>
    %8 = arith.cmpi ne, %6, %7 : vector<32x1xi32>
    %c0_i32_4 = arith.constant 0 : i32
    %9 = vector.broadcast %c0_i32_4 : i32 to vector<32x1xi32>
    %10 = arith.cmpi slt, %6, %9 : vector<32x1xi32>
    %c0_i32_5 = arith.constant 0 : i32
    %11 = arith.cmpi slt, %4, %c0_i32_5 : i32
    %12 = vector.broadcast %11 : i1 to vector<32x1xi1>
    %13 = vector.broadcast %12 : vector<32x1xi1> to vector<32x1xi1>
    %14 = arith.xori %10, %13 : vector<32x1xi1>
    %15 = arith.andi %14, %8 : vector<32x1xi1>
    %16 = vector.broadcast %4 : i32 to vector<32x1xi32>
    %17 = arith.addi %6, %16 : vector<32x1xi32>
    %18 = arith.select %15, %17, %6 : vector<32x1xi1>, vector<32x1xi32>
    %c0_i32_6 = arith.constant 0 : i32
    %19 = vector.broadcast %c0_i32_6 : i32 to vector<32x1xi32>
    %20 = arith.cmpi ne, %18, %19 : vector<32x1xi32>
    %21 = arith.extui %20 : vector<32x1xi1> to vector<32x1xi32>
    %22 = arith.sitofp %21 : vector<32x1xi32> to vector<32x1xf32>
    %c31_i32 = arith.constant 31 : i32
    %23 = vector.broadcast %c31_i32 : i32 to vector<32x1xi32>
    %24 = arith.cmpi ne, %18, %23 : vector<32x1xi32>
    %25 = arith.extui %24 : vector<32x1xi1> to vector<32x1xi32>
    %26 = arith.sitofp %25 : vector<32x1xi32> to vector<32x1xf32>
    %cst = arith.constant dense<0.000000e+00> : vector<32x128xf32>
    %27 = tpu.matmul %1, %0, %cst {dimension_numbers = #tpu.dot_dimension_numbers<[1], [0], [0], [1], [0, 0, 1, 1], [], []>} : vector<32x16xbf16>, vector<16x128xbf16>, vector<32x128xf32> -> vector<32x128xf32>
    %28 = arith.truncf %27 : vector<32x128xf32> to vector<32x128xbf16>
    %c0_7 = arith.constant 0 : index
    %c0_8 = arith.constant 0 : index
    %29 = vector.load %arg3[%c0_7, %c0_8] : memref<128x256xbf16, #tpu.memory_space<vmem>>, vector<128x256xbf16>
    %cst_9 = arith.constant dense<0.000000e+00> : vector<32x256xf32>
    %30 = tpu.matmul %28, %29, %cst_9 {dimension_numbers = #tpu.dot_dimension_numbers<[1], [0], [0], [1], [0, 0, 1, 1], [], []>} : vector<32x128xbf16>, vector<128x256xbf16>, vector<32x256xf32> -> vector<32x256xf32>
    %c0_10 = arith.constant 0 : index
    %c0_11 = arith.constant 0 : index
    %31 = vector.load %arg10[%c0_10, %c0_11] : memref<1x256xf32, #tpu.memory_space<vmem>>, vector<1x256xf32>
    %32 = vector.broadcast %31 : vector<1x256xf32> to vector<32x256xf32>
    %33 = arith.addf %30, %32 : vector<32x256xf32>
    %34 = arith.extf %0 : vector<16x128xbf16> to vector<16x128xf32>
    %c0_12 = arith.constant 0 : index
    %c0_13 = arith.constant 0 : index
    %35 = vector.load %arg6[%c0_12, %c0_13] : memref<1x128xf32, #tpu.memory_space<vmem>>, vector<1x128xf32>
    %36 = vector.broadcast %35 : vector<1x128xf32> to vector<16x128xf32>
    %37 = arith.mulf %34, %36 : vector<16x128xf32>
    %c0_14 = arith.constant 0 : index
    %c0_15 = arith.constant 0 : index
    %38 = vector.load %arg7[%c0_14, %c0_15] : memref<1x128xf32, #tpu.memory_space<vmem>>, vector<1x128xf32>
    %39 = vector.broadcast %38 : vector<1x128xf32> to vector<16x128xf32>
    %40 = arith.addf %37, %39 : vector<16x128xf32>
    %cst_16 = arith.constant 0.000000e+00 : f32
    %41 = vector.broadcast %cst_16 : f32 to vector<16x128xf32>
    %42 = arith.maximumf %40, %41 : vector<16x128xf32>
    %43 = arith.truncf %42 : vector<16x128xf32> to vector<16x128xbf16>
    %cst_17 = arith.constant dense<0.000000e+00> : vector<32x128xf32>
    %44 = tpu.matmul %1, %43, %cst_17 {dimension_numbers = #tpu.dot_dimension_numbers<[1], [0], [0], [1], [0, 0, 1, 1], [], []>} : vector<32x16xbf16>, vector<16x128xbf16>, vector<32x128xf32> -> vector<32x128xf32>
    %c0_18 = arith.constant 0 : index
    %c0_19 = arith.constant 0 : index
    %45 = vector.load %arg11[%c0_18, %c0_19] : memref<1x128xf32, #tpu.memory_space<vmem>>, vector<1x128xf32>
    %c1_i32_20 = arith.constant 1 : i32
    %46 = tpu.dynamic_rotate %44 by %c1_i32_20 dim 0 : vector<32x128xf32>, i32 -> vector<32x128xf32>
    %47 = vector.broadcast %22 : vector<32x1xf32> to vector<32x128xf32>
    %48 = arith.mulf %46, %47 : vector<32x128xf32>
    %49 = arith.truncf %48 : vector<32x128xf32> to vector<32x128xbf16>
    %50 = arith.truncf %44 : vector<32x128xf32> to vector<32x128xbf16>
    %c31_i32_21 = arith.constant 31 : i32
    %51 = tpu.dynamic_rotate %44 by %c31_i32_21 dim 0 : vector<32x128xf32>, i32 -> vector<32x128xf32>
    %52 = vector.broadcast %26 : vector<32x1xf32> to vector<32x128xf32>
    %53 = arith.mulf %51, %52 : vector<32x128xf32>
    %54 = arith.truncf %53 : vector<32x128xf32> to vector<32x128xbf16>
    %55 = tpu.concatenate %49, %50, %54 in 1 : vector<32x128xbf16>, vector<32x128xbf16>, vector<32x128xbf16> -> vector<32x384xbf16>
    %c0_22 = arith.constant 0 : index
    %c0_23 = arith.constant 0 : index
    %56 = vector.load %arg4[%c0_22, %c0_23] : memref<384x128xbf16, #tpu.memory_space<vmem>>, vector<384x128xbf16>
    %cst_24 = arith.constant dense<0.000000e+00> : vector<32x128xf32>
    %57 = tpu.matmul %55, %56, %cst_24 {dimension_numbers = #tpu.dot_dimension_numbers<[1], [0], [0], [1], [0, 0, 1, 1], [], []>} : vector<32x384xbf16>, vector<384x128xbf16>, vector<32x128xf32> -> vector<32x128xf32>
    %58 = vector.broadcast %45 : vector<1x128xf32> to vector<32x128xf32>
    %59 = arith.addf %57, %58 : vector<32x128xf32>
    %c0_25 = arith.constant 0 : index
    %c0_26 = arith.constant 0 : index
    %60 = vector.load %arg8[%c0_25, %c0_26] : memref<1x128xf32, #tpu.memory_space<vmem>>, vector<1x128xf32>
    %61 = vector.broadcast %60 : vector<1x128xf32> to vector<32x128xf32>
    %62 = arith.mulf %59, %61 : vector<32x128xf32>
    %c0_27 = arith.constant 0 : index
    %c0_28 = arith.constant 0 : index
    %63 = vector.load %arg9[%c0_27, %c0_28] : memref<1x128xf32, #tpu.memory_space<vmem>>, vector<1x128xf32>
    %64 = vector.broadcast %63 : vector<1x128xf32> to vector<32x128xf32>
    %65 = arith.addf %62, %64 : vector<32x128xf32>
    %cst_29 = arith.constant 0.000000e+00 : f32
    %66 = vector.broadcast %cst_29 : f32 to vector<32x128xf32>
    %67 = arith.maximumf %65, %66 : vector<32x128xf32>
    %c0_30 = arith.constant 0 : index
    %c0_31 = arith.constant 0 : index
    %68 = vector.load %arg12[%c0_30, %c0_31] : memref<1x256xf32, #tpu.memory_space<vmem>>, vector<1x256xf32>
    %c1_i32_32 = arith.constant 1 : i32
    %69 = tpu.dynamic_rotate %67 by %c1_i32_32 dim 0 : vector<32x128xf32>, i32 -> vector<32x128xf32>
    %70 = vector.broadcast %22 : vector<32x1xf32> to vector<32x128xf32>
    %71 = arith.mulf %69, %70 : vector<32x128xf32>
    %72 = arith.truncf %71 : vector<32x128xf32> to vector<32x128xbf16>
    %73 = arith.truncf %67 : vector<32x128xf32> to vector<32x128xbf16>
    %c31_i32_33 = arith.constant 31 : i32
    %74 = tpu.dynamic_rotate %67 by %c31_i32_33 dim 0 : vector<32x128xf32>, i32 -> vector<32x128xf32>
    %75 = vector.broadcast %26 : vector<32x1xf32> to vector<32x128xf32>
    %76 = arith.mulf %74, %75 : vector<32x128xf32>
    %77 = arith.truncf %76 : vector<32x128xf32> to vector<32x128xbf16>
    %78 = tpu.concatenate %72, %73, %77 in 1 : vector<32x128xbf16>, vector<32x128xbf16>, vector<32x128xbf16> -> vector<32x384xbf16>
    %c0_34 = arith.constant 0 : index
    %c0_35 = arith.constant 0 : index
    %79 = vector.load %arg5[%c0_34, %c0_35] : memref<384x256xbf16, #tpu.memory_space<vmem>>, vector<384x256xbf16>
    %cst_36 = arith.constant dense<0.000000e+00> : vector<32x256xf32>
    %80 = tpu.matmul %78, %79, %cst_36 {dimension_numbers = #tpu.dot_dimension_numbers<[1], [0], [0], [1], [0, 0, 1, 1], [], []>} : vector<32x384xbf16>, vector<384x256xbf16>, vector<32x256xf32> -> vector<32x256xf32>
    %81 = vector.broadcast %68 : vector<1x256xf32> to vector<32x256xf32>
    %82 = arith.addf %80, %81 : vector<32x256xf32>
    %83 = arith.addf %33, %82 : vector<32x256xf32>
    %c0_37 = arith.constant 0 : index
    %c0_38 = arith.constant 0 : index
    %84 = vector.load %arg13[%c0_37, %c0_38] : memref<32x256xf32, #tpu.memory_space<vmem>>, vector<32x256xf32>
    tpu.vector_store %arg13[%c0_37, %c0_38], %83 {strides = array<i32>} : memref<32x256xf32, #tpu.memory_space<vmem>>, vector<32x256xf32>,
    return
  }
  func.func @transform_0(%arg0: i32) -> (i32, i32) {
    %c0_i32 = arith.constant 0 : i32
    %c0_i32_0 = arith.constant 0 : i32
    return %arg0, %c0_i32 : i32, i32
  }
  func.func @transform_1(%arg0: i32) -> (i32, i32) {
    %c0_i32 = arith.constant 0 : i32
    %c0_i32_0 = arith.constant 0 : i32
    %c0_i32_1 = arith.constant 0 : i32
    return %c0_i32, %c0_i32_0 : i32, i32
  }
  func.func @transform_2(%arg0: i32) -> (i32, i32) {
    %c0_i32 = arith.constant 0 : i32
    %c0_i32_0 = arith.constant 0 : i32
    %c0_i32_1 = arith.constant 0 : i32
    return %c0_i32, %c0_i32_0 : i32, i32
  }
  func.func @transform_3(%arg0: i32) -> (i32, i32) {
    %c0_i32 = arith.constant 0 : i32
    %c0_i32_0 = arith.constant 0 : i32
    %c0_i32_1 = arith.constant 0 : i32
    return %c0_i32, %c0_i32_0 : i32, i32
  }
  func.func @transform_4(%arg0: i32) -> (i32, i32) {
    %c0_i32 = arith.constant 0 : i32
    %c0_i32_0 = arith.constant 0 : i32
    %c0_i32_1 = arith.constant 0 : i32
    return %c0_i32, %c0_i32_0 : i32, i32
  }
  func.func @transform_5(%arg0: i32) -> (i32, i32) {
    %c0_i32 = arith.constant 0 : i32
    %c0_i32_0 = arith.constant 0 : i32
    %c0_i32_1 = arith.constant 0 : i32
    return %c0_i32, %c0_i32_0 : i32, i32
  }
  func.func @transform_6(%arg0: i32) -> (i32, i32) {
    %c0_i32 = arith.constant 0 : i32
    %c0_i32_0 = arith.constant 0 : i32
    %c0_i32_1 = arith.constant 0 : i32
    return %c0_i32, %c0_i32_0 : i32, i32
  }
  func.func @transform_7(%arg0: i32) -> (i32, i32) {
    %c0_i32 = arith.constant 0 : i32
    %c0_i32_0 = arith.constant 0 : i32
    %c0_i32_1 = arith.constant 0 : i32
    return %c0_i32, %c0_i32_0 : i32, i32
  }
  func.func @transform_8(%arg0: i32) -> (i32, i32) {
    %c0_i32 = arith.constant 0 : i32
    %c0_i32_0 = arith.constant 0 : i32
    %c0_i32_1 = arith.constant 0 : i32
    return %c0_i32, %c0_i32_0 : i32, i32
  }
  func.func @transform_9(%arg0: i32) -> (i32, i32) {
    %c0_i32 = arith.constant 0 : i32
    %c0_i32_0 = arith.constant 0 : i32
    %c0_i32_1 = arith.constant 0 : i32
    return %c0_i32, %c0_i32_0 : i32, i32
  }
  func.func @transform_10(%arg0: i32) -> (i32, i32) {
    %c0_i32 = arith.constant 0 : i32
    %c0_i32_0 = arith.constant 0 : i32
    %c0_i32_1 = arith.constant 0 : i32
    return %c0_i32, %c0_i32_0 : i32, i32
  }
  func.func @transform_11(%arg0: i32) -> (i32, i32) {
    %c0_i32 = arith.constant 0 : i32
    %c0_i32_0 = arith.constant 0 : i32
    %c0_i32_1 = arith.constant 0 : i32
    return %c0_i32, %c0_i32_0 : i32, i32
  }
  func.func @transform_12(%arg0: i32) -> (i32, i32) {
    %c0_i32 = arith.constant 0 : i32
    %c0_i32_0 = arith.constant 0 : i32
    return %arg0, %c0_i32 : i32, i32
  }
}

</mosaic_0001>

<bundles_post_ra>
// kernel: tpu_custom_call.1
= control target key start
LH: loop header
LB: loop body
LE: loop exit
PB: predicated region body
PF: predicated region fallthrough
CT: control target
= control target key end

     0   :  { %s2745_s0 = inlined_call_operand.vmem [shape: bf16[32,128], index: 0, kind: input, shape index: {}]   ;;  %s2746_s1 = inlined_call_operand.vmem [shape: bf16[32,16], index: 1, kind: input, shape index: {}]   ;;  %s2747_s2 = inlined_call_operand.hbm [shape: bf16[128,256], index: 2, kind: input, shape index: {}]   ;;  %s2748_s3 = inlined_call_operand.hbm [shape: bf16[384,128], index: 3, kind: input, shape index: {}]   ;;  %s2749_s4 = inlined_call_operand.hbm [shape: bf16[384,256], index: 4, kind: input, shape index: {}]   ;;  %s2750_s5 = inlined_call_operand.vmem [shape: f32[1,128], index: 5, kind: input, shape index: {}]   ;;  %s2751_s6 = inlined_call_operand.vmem [shape: f32[1,128], index: 6, kind: input, shape index: {}]   ;;  %s2752_s7 = inlined_call_operand.vmem [shape: f32[1,128], index: 7, kind: input, shape index: {}]   ;;  %s2753_s8 = inlined_call_operand.vmem [shape: f32[1,128], index: 8, kind: input, shape index: {}]   ;;  %s2754_s9 = inlined_call_operand.vmem [shape: f32[1,256], index: 9, kind: input, shape index: {}]   ;;  %s2755_s10 = inlined_call_operand.vmem [shape: f32[1,128], index: 10, kind: input, shape index: {}]   ;;  %s2756_s11 = inlined_call_operand.vmem [shape: f32[1,256], index: 11, kind: input, shape index: {}]   ;;  %s2757_s12 = inlined_call_operand.hbm [shape: f32[64,256], index: 12, kind: output, shape index: {}]  }
   0x1   :  { %2768 = sst [smem:[#allocation18_spill]] %s2748_s3 }
   0x2   :  { %2769 = sst [smem:[#allocation19_spill]] %s2757_s12 }
   0x3   :  { %17 = vsyncpa [#allocation3], 0 }
   0x4   :  { %18 = vsyncpa [#allocation6], 0 }
   0x5   :  { %19 = vsyncpa [#allocation4], 0 }
   0x6   :  { %21 = vsyncpa [#allocation4 + $0x1], 0  ;;  %s2431_s21 = smov 0   ;;  %s2433_s22 = smov 0  }
   0x7   :  { %s2435_s23 = smov 0   ;;  %s2437_s24 = smov 0  }
   0x8 LB: > { %2770 = sst [smem:[#allocation12_spill]] %s2340_s21  ;;  %s2452_s25 = sadd.s32 4294967295, %s2352_s24   ;;  %s2352_s24 = sphi %s2437_s24, %s2793_s24   ;;  %s2348_s23 = sphi %s2435_s23, %s2795_s23   ;;  %s2344_s22 = sphi %s2433_s22, %s2797_s22   ;;  %s2340_s21 = sphi %s2431_s21, %s2796_s21  }
   0x9   : > { %2771 = sst [smem:[#allocation13_spill]] %s2348_s23  ;;  %s1765_s26 = sadd.s32 4294967294, %s2352_s24  }
   0xa   : > { %2772 = sst [smem:[#allocation14_spill]] %s2352_s24  ;;  %s2456_s27 = sadd.s32 1, %s2352_s24  }
   0xb   : > { %2773 = sst [smem:[#allocation15_spill]] %s2456_s27  ;;  %s291_s28 = sadd.s32 1, %s2348_s23 }
   0xc   : > { %s288_s29 = ssub.s32 %s2352_s24, %s2456_s27  ;;  %p301_p0 = scmp.ne.s32.totalorder %s2348_s23, %s2344_s22 }
   0xd   : > { %p289_p1 = scmp.eq.s32.totalorder %s288_s29, 0  ;;  %p302_p2 = scmp.eq.s32.totalorder %s2452_s25, 1 }
   0xe   : > { %p307_p3 = scmp.ne.s32.totalorder %s2344_s22, %s2340_s21  ;;  %p308_p4 = scmp.eq.s32.totalorder %s1765_s26, 1 }
   0xf   : > { %s2467_s30 = scalar_select %p289_p1, %s2348_s23, %s291_s28  }
  0x10   : > { %p2469_p5 = por %p302_p2, %p301_p0  ;;  %p2473_p6 = por %p308_p4, %p307_p3 }
  0x11   : > { %2774 = sst [smem:[#allocation16_spill]] %s2467_s30  ;;  %p1766_p7 = scmp.ge.s32.totalorder %s2352_s24, 1 }
  0x12   : > { %s2775_s13 = scalar_select %p2469_p5, 1, 0 }
  0x13   : > { %s2776_s14 = scalar_select %p2473_p6, 1, 0 }
  0x14   : > { %p315_p8 = scmp.lt.s32.totalorder %s2352_s24, 3  ;;  %p2761_p9 = scmp.eq.s32.totalorder %s2452_s25, 0 }
  0x15   : > { %2777 = sst [smem:[#allocation17_spill]] %s2776_s14  ;;  %s2354_s16 = smov [#allocation5]  }
  0x16   : > { %p2480_p10 = pnand %p1766_p7, %p315_p8  ;;  %s343_s17 = sshll.u32 %s2354_s16, 4  ;;  %s344_s17 = int_to_ptr.vmem [resolvable:$true] %s343_s17 }
  0x17   : > { %s2355_s19 = smov [#allocation2]   ;;  %s2780_s3 = sld [smem:[#allocation18_spill]] }
  0x18   : > { %s2778_s15 = scalar_select %p2480_p10, 1, 0 }
  0x19   : > { %p2010_p11 = pneg %p2480_p10  ;;  %s330_s20 = sshll.u32 %s2355_s19, 4  ;;  %s2492_s20 = int_to_ptr.vmem [resolvable:$true] %s330_s20 }
  0x1b   : > { %p2488_p12 = pnand %p2761_p9, %p2010_p11 }
  0x1d   : > { %s2198_s29 = scalar_lea.hbm %s2780_s3, 3072  ;;  %p2502_p0 = pneg %p2488_p12 }
  0x1e   : > { %p2199_p13 = scmp.ne.s32.totalorder %s2780_s3, %s2198_s29  ;;  %p2205_p3 = scmp.lt.u32.totalorder %s2198_s29, %s2780_s3 }
  0x20   : > { %p2201_p1 = pnand %p2502_p0, %p2199_p13 }
  0x22   : > { %p2202_p2 = pneg %p2201_p1 }
  0x24   : > { %p2207_p4 = pnand %p2205_p3, %p2202_p2 }
  0x26   : > { %2210 = shalt.err (!%p2207_p4)
}
  0x27   : > { %s2211_s26 = scalar_lea.vmem %s344_s17, 3072  ;;  %p2219_p9 = scmp.lt.s32.totalorder %s344_s17, %s344_s17 }
  0x28   : > { %p2212_p7 = scmp.ne.s32.totalorder %s344_s17, %s2211_s26  ;;  %p2220_p6 = scmp.lt.s32.totalorder %s2211_s26, %s2211_s26 }
  0x2a   : > { %p2214_p8 = pnand %p2212_p7, %p2502_p0  ;;  %p2221_p5 = por %p2220_p6, %p2219_p9 }
  0x2c   : > { %p2215_p11 = pneg %p2214_p8 }
  0x2e   : > { %p2222_p10 = pnand %p2221_p5, %p2215_p11 }
  0x30   : > { %2225 = shalt.err (!%p2222_p10)
}
  0x31   : > { %s2356_s23 = smov 64   ;;  %s2357_s30 = smov 4  }
  0x32   : > { %2016 = dma.hbm_to_vmem [thread:$0]  (!%p2488_p12), %s2780_s3, 3072, %s344_s17, [#allocation6], %s2356_s23, %s2356_s23, %s2357_s30  }
  0x33   : > { %s2226_s14 = scalar_lea.hbm %s2747_s2, 2048 }
  0x34   : > { %p2227_p13 = scmp.ne.s32.totalorder %s2747_s2, %s2226_s14  ;;  %p2233_p9 = scmp.lt.u32.totalorder %s2226_s14, %s2747_s2 }
  0x36   : > { %p2229_p5 = pnand %p2227_p13, %p2502_p0 }
  0x38   : > { %p2230_p6 = pneg %p2229_p5 }
  0x3a   : > { %p2235_p10 = pnand %p2233_p9, %p2230_p6 }
  0x3c   : > { %2238 = shalt.err (!%p2235_p10)
}
  0x3d   : > { %s2239_s17 = scalar_lea.vmem %s2492_s20, 2048  ;;  %p2247_p4 = scmp.lt.s32.totalorder %s2492_s20, %s2492_s20 }
  0x3e   : > { %p2240_p1 = scmp.ne.s32.totalorder %s2492_s20, %s2239_s17  ;;  %p2248_p7 = scmp.lt.s32.totalorder %s2239_s17, %s2239_s17 }
  0x40   : > { %p2242_p2 = pnand %p2240_p1, %p2502_p0  ;;  %p2249_p8 = por %p2248_p7, %p2247_p4 }
  0x42   : > { %p2243_p3 = pneg %p2242_p2 }
  0x44   : > { %p2250_p11 = pnand %p2249_p8, %p2243_p3 }
  0x46   : > { %2253 = shalt.err (!%p2250_p11)
}
  0x47   : > { %s2358_s21 = smov 128   ;;  %s2359_s12 = smov 8  }
  0x48   : > { %2013 = dma.hbm_to_vmem [thread:$0]  (!%p2488_p12), %s2747_s2, 2048, %s2492_s20, [#allocation3], %s2358_s21, %s2358_s21, %s2359_s12  }
  0x49   : > { %s2360_s23 = smov [#allocation7]   ;;  %s2254_s29 = scalar_lea.hbm %s2749_s4, 6144 }
  0x4a   : > { %s356_s30 = sshll.u32 %s2360_s23, 4  ;;  %p2255_p13 = scmp.ne.s32.totalorder %s2749_s4, %s2254_s29  ;;  %s357_s30 = int_to_ptr.vmem [resolvable:$true] %s356_s30 }
  0x4b   : > { %p2261_p9 = scmp.lt.u32.totalorder %s2254_s29, %s2749_s4 }
  0x4c   : > { %p2257_p5 = pnand %p2255_p13, %p2502_p0 }
  0x4e   : > { %p2258_p6 = pneg %p2257_p5 }
  0x50   : > { %p2263_p10 = pnand %p2261_p9, %p2258_p6 }
  0x52   : > { %2266 = shalt.err (!%p2263_p10)
}
  0x53   : > { %s2267_s20 = scalar_lea.vmem %s357_s30, 6144  ;;  %p2275_p4 = scmp.lt.s32.totalorder %s357_s30, %s357_s30 }
  0x54   : > { %p2268_p1 = scmp.ne.s32.totalorder %s357_s30, %s2267_s20  ;;  %p2276_p7 = scmp.lt.s32.totalorder %s2267_s20, %s2267_s20 }
  0x56   : > { %p2270_p2 = pnand %p2268_p1, %p2502_p0  ;;  %p2277_p8 = por %p2276_p7, %p2275_p4 }
  0x58   : > { %p2271_p3 = pneg %p2270_p2 }
  0x5a   : > { %p2278_p11 = pnand %p2277_p8, %p2271_p3 }
  0x5c   : > { %2281 = shalt.err (!%p2278_p11)
}
  0x5d   : > { %2019 = dma.hbm_to_vmem [thread:$0]  (!%p2488_p12), %s2749_s4, 6144, %s357_s30, [#allocation6], %s2358_s21, %s2358_s21, %s2359_s12  }
  0x5e   : > { %p2782_p13 = scmp.ne.s32.totalorder %s2778_s15, 0 }
  0x5f   : > { %p2783_p5 = scmp.eq.s32.totalorder (!%p2782_p13), %s2452_s25, 0 }
  0x60   : > { %402 = sbr.rel (%p2782_p13) target bundleno = 839 (0x347), region = 68 }
  0x67   : > { %2327 = dma.done.wait (%p2783_p5), [#allocation3], 2048   ;;  %p2784_p0 = pmov %p2783_p5 }
  0x69   : > { %2329 = vsyncadd (%p2784_p0), [#allocation3], 4294965248  ;;  %p2785_p6 = pmov %p2784_p0 }
  0x6a   : > { %p2786_p9 = pmov %p2784_p0 }
  0x6b   : > { %2331 = dma.done.wait (%p2785_p6), [#allocation6], 9216  }
  0x6c   : > { %2333 = vsyncadd (%p2786_p9), [#allocation6], 4294958080  ;;  %s1776_s3 = sshll.u32 %s2452_s25, 1  ;;  %v1801_v1 = vld [vmem:[%s2750_s5] ss:$0 sm:$0xff]  ;;  %vm559_vm0 = vcmask 130048   ;;  %v466_v49 = vlaneseq }
  0x6d   : > { %p453_p10 = scmp.lt.s32.totalorder %s1776_s3, 3  ;;  %v2075_v4 = vld [vmem:[%s2746_s1] sm:$0xff]   ;;  %v2076_v5 = vld [vmem:[%s2746_s1 + $0x8] sm:$0xff]   ;;  %v2082_v13 = vld [vmem:[#allocation2 + $0x14] ss:$8 sps:$4 sm:$0xff]   ;;  %v2361_v42 = vmov 0  }
  0x6e   : > { %v1802_v6 = vld [vmem:[%s2751_s6] ss:$0 sm:$0xff]  ;;  %1934 = vmatprep.mubr.msk.bf16.mxu1 %vm559_vm0, %v2075_v4  ;;  %1940 = vmatprep.mubr.msk.bf16.mxu0 %vm559_vm0, %v2075_v4  ;;  %v2079_v10 = vld [vmem:[#allocation2 + $0x4] ss:$8 sps:$4 sm:$0xff]   ;;  %v2080_v16 = vld [vmem:[#allocation2 + $0x10] ss:$8 sps:$4 sm:$0xff]  }
  0x6f   : > { %s2799_s3 = smov (!%p453_p10, %s1776_s3), 3  ;;  %v2077_v9 = vld [vmem:[#allocation2] ss:$8 sps:$4 sm:$0xff]   ;;  %v2085_v17 = vld [vmem:[#allocation2 + $0x24] ss:$8 sps:$4 sm:$0xff]   ;;  %v2099_v27 = vld [vmem:[#allocation5 + $0x50] sm:$0xff]  }
  0x70   : > { %s1777_s18 = sshll.u32 %s2799_s3, 2  ;;  %v2089_v19 = vld [vmem:[#allocation5 + $0x40] sm:$0xff]   ;;  %v2088_v21 = vld [vmem:[#allocation2 + $0x34] ss:$8 sps:$4 sm:$0xff]   ;;  %v2094_v23 = vld [vmem:[#allocation5 + $0x48] sm:$0xff]   ;;  %v2590_v50 = vshrl.u32 %v466_v49, 7 }
  0x71   : > { %s456_s21 = scalar_lea.vmem %s2745_s0, %s1777_s18  ;;  %v2083_v20 = vld [vmem:[#allocation2 + $0x20] ss:$8 sps:$4 sm:$0xff]   ;;  %v2086_v24 = vld [vmem:[#allocation2 + $0x30] ss:$8 sps:$4 sm:$0xff]   ;;  %v2093_v25 = vld [vmem:[#allocation2 + $0x44] ss:$8 sps:$4 sm:$0xff]  }
  0x72   : > { %v460_v0 = vld [vmem:[%s456_s21] sm:$0xff]   ;;  %v2095_v26 = vld [vmem:[#allocation5 + $0x8] sm:$0xff]   ;;  %v2098_v29 = vld [vmem:[#allocation2 + $0x54] ss:$8 sps:$4 sm:$0xff]   ;;  %v470_v52 = vadd.s32 24, %v2590_v50  ;;  %v475_v57 = vand.u32 31, %v2590_v50 }
  0x73   : > { %v778_v2 = vunpack.c.l.bf16 %v460_v0  ;;  %v779_v3 = vunpack.c.h.bf16 %v460_v0  ;;  %1932 = vmatprep.subr.bf16.mxu1 %v460_v0  ;;  %v2090_v22 = vld [vmem:[#allocation5] sm:$0xff]   ;;  %v2100_v30 = vld [vmem:[#allocation5 + $0x10] sm:$0xff]   ;;  %v2104_v31 = vld [vmem:[#allocation5 + $0x58] sm:$0xff]   ;;  %vm855_vm3 = vcmp.lt.s32.totalorder %v2590_v50, 1  ;;  %v2362_v4 = vmov 0.0   ;;  %s449_s23 = sand.u32 1, %s2344_s22  }
  0x74   : > { %1933 = vmatpush3.bf16.msra.mxu1 %v460_v0  ;;  %v2091_v28 = vld [vmem:[#allocation2 + $0x40] ss:$8 sps:$4 sm:$0xff]   ;;  %v2096_v32 = vld [vmem:[#allocation2 + $0x50] ss:$8 sps:$4 sm:$0xff]   ;;  %v2103_v34 = vld [vmem:[#allocation2 + $0x64] ss:$8 sps:$4 sm:$0xff]  }
  0x75   : > { %v787_v7 = vmul.f32 %v1801_v1, %v778_v2  ;;  %v788_v8 = vmul.f32 %v1801_v1, %v779_v3  ;;  %725 = vmatprep.subr.bf16.mxu1 %v2079_v10  ;;  %v2105_v33 = vld [vmem:[#allocation5 + $0x18] sm:$0xff]   ;;  %v2101_v35 = vld [vmem:[#allocation2 + $0x60] ss:$8 sps:$4 sm:$0xff]   ;;  %v2115_v44 = vld [vmem:[#allocation5 + $0x70] sm:$0xff]   ;;  %v496_v60 = vand.u32 31, %v470_v52  ;;  %vm519_vm1 = vcmp.ne.s32.totalorder %v475_v57, 0 }
  0x76   : > { %v2108_v36 = vld [vmem:[#allocation2 + $0x74] ss:$8 sps:$4 sm:$0xff]   ;;  %v2106_v37 = vld [vmem:[#allocation2 + $0x70] ss:$8 sps:$4 sm:$0xff]   ;;  %v2109_v38 = vld [vmem:[#allocation5 + $0x60] sm:$0xff]   ;;  %vm872_vm4 = vcmp.lt.s32.totalorder %v2590_v50, 7 }
  0x77   : > { %v796_v11 = vadd.f32 %v1802_v6, %v787_v7  ;;  %v797_v12 = vadd.f32 %v1802_v6, %v788_v8  ;;  %1935 = vmatmul.mubr.msk.bf16.vlgmr.msra.gmra.mrb[0].mxu1 %vm559_vm0, %v2076_v5  ;;  %v2110_v39 = vld [vmem:[#allocation5 + $0x20] sm:$0xff]   ;;  %v2112_v41 = vld [vmem:[#allocation5 + $0x68] sm:$0xff]   ;;  %v2116_v45 = vld [vmem:[#allocation5 + $0x30] sm:$0xff]   ;;  %vm534_vm2 = vcmp.ne.s32.totalorder %v496_v60, 31  ;;  %s1775_s30 = sshll.u32 %s449_s23, 6  ;;  %s1887_s29 = sshll.u32 %s2452_s25, 10 }
  0x78   : > { %726 = vmatpush1.bf16.msra.mxu1 %v2077_v9  ;;  %v2111_v40 = vld [vmem:[#allocation5 + $0x80] sm:$0xff]   ;;  %757 = vmatprep.mubr.bf16.mxu1 %v2361_v42  ;;  %v2113_v43 = vld [vmem:[#allocation5 + $0x28] sm:$0xff]   ;;  %v2118_v46 = vld [vmem:[#allocation5 + $0x78] sm:$0xff]   ;;  %v2599_v7 = vsel %vm534_vm2, 1.0, %v2362_v4  ;;  %s2682_s27 = scalar_lea.vmem [#allocation8], %s1775_s30  ;;  %s2787_s17 = sld [smem:[#allocation19_spill]] }
  0x79   : > { %v798_v14 = vmax.f32 %v796_v11, 0.0  ;;  %v799_v15 = vmax.f32 %v797_v12, 0.0  ;;  %727 = vmatprep.subr.bf16.mxu1 %v2082_v13  ;;  %v2119_v47 = vld [vmem:[#allocation5 + $0x38] sm:$0xff]   ;;  %v2127_v48 = vld [vmem:[#allocation7 + $0x4] ss:$8 sps:$4 sm:$0xff]   ;;  %v2117_v62 = vld [vmem:[#allocation5 + $0x90] sm:$0xff]  }
  0x7a   : > { %v2114_v59 = vld [vmem:[#allocation5 + $0x88] sm:$0xff]   ;;  %v2146_v49 = vld [vmem:[#allocation7 + $0x70] ss:$8 sps:$4 sm:$0xff]   ;;  %v2160_v57 = vld [vmem:[#allocation7 + $0x94] ss:$8 sps:$4 sm:$0xff]   ;;  %s1672_s28 = sshll.u32 %s2682_s27, 4  ;;  %s2691_s28 = int_to_ptr.vmem [resolvable:$true] %s1672_s28 }
  0x7b   : > { %v800_v18 = vpack.c.bf16 %v799_v15, %v798_v14  ;;  %v2120_v15 = vld [vmem:[#allocation5 + $0x98] sm:$0xff]   ;;  %v2149_v52 = vld [vmem:[#allocation7 + $0x100] ss:$8 sps:$4 sm:$0xff]   ;;  %s2704_s25 = scalar_lea.sflag [#allocation4], %s449_s23  ;;  %s2282_s24 = scalar_lea.vmem %s2691_s28, 1024 }
  0x7c   : > { %728 = vmatpush1.bf16.msra.mxu1 %v2080_v16  ;;  %v2161_v60 = vld [vmem:[#allocation7 + $0x120] ss:$8 sps:$4 sm:$0xff]   ;;  %p2283_p12 = scmp.ne.s32.totalorder %s2691_s28, %s2282_s24  ;;  %p2788_p1 = scmp.ne.s32.totalorder %s2775_s13, 0 }
  0x7d   : > { %1938 = vmatprep.subr.bf16.mxu0 %v800_v18  ;;  %729 = vmatprep.subr.bf16.mxu1 %v2085_v17  ;;  %s2363_s14 = smov [#allocation8]  }
  0x7e   : > { %1939 = vmatpush3.bf16.msra.mxu0 %v800_v18  ;;  %s2698_s20 = scalar_lea.hbm %s2787_s17, %s1887_s29  ;;  %p2284_p2 = pnand %p2283_p12, %p2788_p1 }
  0x7f   : > { %1894 = vmatprep.subr.bf16.mxu0 %v2089_v19  ;;  %s2286_s3 = sshll.u32 %s2363_s14, 4  ;;  %s2287_s3 = int_to_ptr.vmem [resolvable:$false] %s2286_s3 }
  0x80   : > { %730 = vmatpush1.bf16.msra.mxu1 %v2083_v20  ;;  %p2285_p3 = pneg %p2284_p2  ;;  %s2288_s18 = scalar_lea.vmem %s2287_s3, 2048 }
  0x81   : > { %1941 = vmatmul.mubr.msk.bf16.vlgmr.msra.gmra.mrb[0].mxu0 %vm559_vm0, %v2076_v5  ;;  %731 = vmatprep.subr.bf16.mxu1 %v2088_v21  ;;  %v2596_v5 = vsel %vm519_vm1, 1.0, %v2362_v4  ;;  %v2173_v4 = vld [vmem:[#allocation7 + $0x140] ss:$8 sps:$4 sm:$0xff]   ;;  %p2289_p4 = scmp.lt.s32.totalorder %s2691_s28, %s2287_s3  ;;  %p2290_p7 = scmp.lt.s32.totalorder %s2288_s18, %s2282_s24 }
  0x82   : > { %1895 = vmatpush3.bf16.msra.mxu0 %v2090_v22 }
  0x83   : > { %1896 = vmatprep.subr.bf16.mxu0 %v2094_v23  ;;  %p2291_p8 = por %p2290_p7, %p2289_p4 }
  0x84   : > { %732 = vmatpush1.bf16.msra.mxu1 %v2086_v24 }
  0x85   : > { %733 = vmatprep.subr.bf16.mxu1 %v2093_v25  ;;  %p2292_p11 = pnand %p2291_p8, %p2285_p3 }
  0x86   : > { %1897 = vmatpush3.bf16.msra.mxu0 %v2095_v26 }
  0x87   : > { %1898 = vmatprep.subr.bf16.mxu0 %v2099_v27 }
  0x88   : > { %734 = vmatpush1.bf16.msra.mxu1 %v2091_v28 }
  0x89   : > { %735 = vmatprep.subr.bf16.mxu1 %v2098_v29  ;;  %v2121_v29 = vld [vmem:[#allocation5 + $0xa0] sm:$0xff]  }
  0x8a   : > { %1899 = vmatpush3.bf16.msra.mxu0 %v2100_v30 }
  0x8b   : > { %1900 = vmatprep.subr.bf16.mxu0 %v2104_v31  ;;  %v2125_v31 = vld [vmem:[#allocation7] ss:$8 sps:$4 sm:$0xff]  }
  0x8c   : > { %736 = vmatpush1.bf16.msra.mxu1 %v2096_v32  ;;  %v2130_v32 = vld [vmem:[#allocation7 + $0x14] ss:$8 sps:$4 sm:$0xff]  }
  0x8d   : > { %737 = vmatprep.subr.bf16.mxu1 %v2103_v34  ;;  %v2128_v34 = vld [vmem:[#allocation7 + $0x10] ss:$8 sps:$4 sm:$0xff]  }
  0x8e   : > { %1901 = vmatpush3.bf16.msra.mxu0 %v2105_v33  ;;  %v2122_v33 = vld [vmem:[#allocation5 + $0xa8] sm:$0xff]  }
  0x8f   : > { %1902 = vmatprep.subr.bf16.mxu0 %v2109_v38  ;;  %v2136_v38 = vld [vmem:[#allocation7 + $0x34] ss:$8 sps:$4 sm:$0xff]  }
  0x90   : > { %738 = vmatpush1.bf16.msra.mxu1 %v2101_v35  ;;  %v2133_v35 = vld [vmem:[#allocation7 + $0x24] ss:$8 sps:$4 sm:$0xff]  }
  0x91   : > { %739 = vmatprep.subr.bf16.mxu1 %v2108_v36  ;;  %v2123_v36 = vld [vmem:[#allocation5 + $0xb0] sm:$0xff]  }
  0x92   : > { %1903 = vmatpush3.bf16.msra.mxu0 %v2110_v39  ;;  %v2124_v39 = vld [vmem:[#allocation5 + $0xb8] sm:$0xff]  }
  0x93   : > { %1904 = vmatprep.subr.bf16.mxu0 %v2112_v41  ;;  %v2139_v41 = vld [vmem:[#allocation7 + $0x44] ss:$8 sps:$4 sm:$0xff]  }
  0x94   : > { %740 = vmatpush1.bf16.msra.mxu1 %v2106_v37  ;;  %v2131_v37 = vld [vmem:[#allocation7 + $0x20] ss:$8 sps:$4 sm:$0xff]  }
  0x95   : > { %1944 = vmatprep.subr.bf16.mxu1 %v2111_v40 }
  0x96   : > { %1905 = vmatpush3.bf16.msra.mxu0 %v2113_v43  ;;  %v2137_v43 = vld [vmem:[#allocation7 + $0x40] ss:$8 sps:$4 sm:$0xff]  }
  0x97   : > { %1906 = vmatprep.subr.bf16.mxu0 %v2115_v44  ;;  %v2140_v44 = vld [vmem:[#allocation7 + $0x50] ss:$8 sps:$4 sm:$0xff]  }
  0x9a   : > { %1907 = vmatpush3.bf16.msra.mxu0 %v2116_v45  ;;  %v2142_v45 = vld [vmem:[#allocation7 + $0x54] ss:$8 sps:$4 sm:$0xff]  }
  0x9b   : > { %1908 = vmatprep.subr.bf16.mxu0 %v2118_v46  ;;  %v2145_v46 = vld [vmem:[#allocation7 + $0x64] ss:$8 sps:$4 sm:$0xff]  }
  0x9e   : > { %1909 = vmatpush3.bf16.msra.mxu0 %v2119_v47  ;;  %v2143_v47 = vld [vmem:[#allocation7 + $0x60] ss:$8 sps:$4 sm:$0xff]  }
  0x9f   : > { %1535 = vmatprep.subr.bf16.mxu0 %v2127_v48  ;;  %v2148_v48 = vld [vmem:[#allocation7 + $0x74] ss:$8 sps:$4 sm:$0xff]  }
 0x14a   : > { %v1936_v51 = vpop.f32.mrb[0].mxu1 }
 0x14b   : > { %v600_v53 = vpop.f32.mrb[1].mxu1 }
 0x14c   : > { %v1937_v54 = vpop.f32.mrb[2].mxu1 }
 0x14d   : > { %v616_v55 = vpack.c.bf16 %v1937_v54, %v1936_v51  ;;  %v603_v56 = vpop.f32.mrb[3].mxu1  ;;  %v2151_v51 = vld [vmem:[#allocation7 + $0x104] ss:$8 sps:$4 sm:$0xff]  }
 0x14e   : > { %v615_v58 = vpack.c.bf16 %v603_v56, %v600_v53  ;;  %v2152_v53 = vld [vmem:[#allocation7 + $0x80] ss:$8 sps:$4 sm:$0xff]   ;;  %v2154_v54 = vld [vmem:[#allocation7 + $0x84] ss:$8 sps:$4 sm:$0xff]   ;;  %v2155_v56 = vld [vmem:[#allocation7 + $0x110] ss:$8 sps:$4 sm:$0xff]  }
 0x150   : > { %758 = vmatmul.mubr.bf16.vlgmr.msra.gmra.mrb[4].mxu1 %v615_v58  ;;  %v2158_v58 = vld [vmem:[#allocation7 + $0x90] ss:$8 sps:$4 sm:$0xff]  }
 0x151   : > { %1945 = vmatpush3.bf16.msra.mxu1 %v2111_v40  ;;  %767 = vmatprep.mubr.bf16.mxu1 %v2361_v42  ;;  %v2134_v40 = vld [vmem:[#allocation7 + $0x30] ss:$8 sps:$4 sm:$0xff]  }
 0x152   : > { %1946 = vmatprep.subr.bf16.mxu1 %v2114_v59 }
 0x154   : > { %v1942_v61 = vpop.f32.mrb[0].mxu0 }
 0x155   : > { %v853_v63 = vrot.slane %v1942_v61, 7  ;;  %v870_v0 = vrot.slane %v1942_v61, 1  ;;  %v835_v1 = vpop.f32.mrb[1].mxu0  ;;  %1947 = vmatpush3.bf16.msra.mxu1 %v2114_v59  ;;  %v2163_v59 = vld [vmem:[#allocation7 + $0x124] ss:$8 sps:$4 sm:$0xff]  }
 0x156   : > { %v851_v2 = vrot.slane %v835_v1, 7  ;;  %v868_v3 = vrot.slane %v835_v1, 1  ;;  %v1943_v6 = vpop.f32.mrb[2].mxu0  ;;  %1948 = vmatprep.subr.bf16.mxu1 %v2117_v62 }
 0x157   : > { %v854_v8 = vrot.slane %v1943_v6, 7  ;;  %v867_v9 = vpack.c.bf16 %v1943_v6, %v1942_v61  ;;  %v871_v10 = vrot.slane %v1943_v6, 1  ;;  %v838_v11 = vpop.f32.mrb[3].mxu0  ;;  %v2164_v61 = vld [vmem:[#allocation7 + $0xa0] ss:$8 sps:$4 sm:$0xff]  }
 0x158   : > { %v852_v12 = vrot.slane %v838_v11, 7  ;;  %v866_v13 = vpack.c.bf16 %v838_v11, %v835_v1  ;;  %v869_v14 = vrot.slane %v838_v11, 1  ;;  %768 = vmatmul.mubr.bf16.gmra.mrb[8].mxu1 %v616_v55  ;;  %v2157_v55 = vld [vmem:[#allocation7 + $0x114] ss:$8 sps:$4 sm:$0xff]   ;;  %v2178_v6 = vld [vmem:[#allocation7 + $0xc4] ss:$8 sps:$4 sm:$0xff]  }
 0x159   : > { %v859_v16 = vsel %vm855_vm3, %v854_v8, %v851_v2  ;;  %v873_v17 = vsel %vm872_vm4, %v870_v0, %v871_v10  ;;  %v876_v18 = vsel %vm872_vm4, %v871_v10, %v868_v3  ;;  %v856_v19 = vsel %vm855_vm3, %v853_v63, %v854_v8  ;;  %1949 = vmatpush3.bf16.msra.mxu1 %v2117_v62  ;;  %v2166_v62 = vld [vmem:[#allocation7 + $0xa4] ss:$8 sps:$4 sm:$0xff]   ;;  %v2172_v1 = vld [vmem:[#allocation7 + $0xb4] ss:$8 sps:$4 sm:$0xff]   ;;  %v2176_v8 = vld [vmem:[#allocation7 + $0xc0] ss:$8 sps:$4 sm:$0xff]  }
 0x15a   : > { %v860_v20 = vmul.f32 %v2596_v5, %v859_v16  ;;  %v880_v21 = vmul.f32 %v2599_v7, %v876_v18  ;;  %v858_v22 = vsel %vm855_vm3, %v851_v2, %v852_v12  ;;  %1113 = vmatprep.mubr.bf16.mxu0 %v866_v13  ;;  %v874_v23 = vsel %vm872_vm4, %v869_v14, %v870_v0  ;;  %v2167_v0 = vld [vmem:[#allocation7 + $0x130] ss:$8 sps:$4 sm:$0xff]   ;;  %v2184_v11 = vld [vmem:[#allocation7 + $0xd4] ss:$8 sps:$4 sm:$0xff]   ;;  %v2187_v13 = vld [vmem:[#allocation7 + $0x164] ss:$8 sps:$4 sm:$0xff]  }
 0x15b   : > { %v875_v24 = vsel %vm872_vm4, %v868_v3, %v869_v14  ;;  %v857_v25 = vsel %vm855_vm3, %v852_v12, %v853_v63  ;;  %1950 = vmatprep.subr.bf16.mxu1 %v2120_v15  ;;  %v2169_v63 = vld [vmem:[#allocation7 + $0x134] ss:$8 sps:$4 sm:$0xff]   ;;  %v2170_v2 = vld [vmem:[#allocation7 + $0xb0] ss:$8 sps:$4 sm:$0xff]   ;;  %v2175_v3 = vld [vmem:[#allocation7 + $0x144] ss:$8 sps:$4 sm:$0xff]  }
 0x15c   : > { %v882_v26 = vpack.c.bf16 %v880_v21, %v873_v17  ;;  %v864_v27 = vpack.c.bf16 %v858_v22, %v860_v20  ;;  %v881_v28 = vpack.c.bf16 %v874_v23, %v875_v24  ;;  %v865_v30 = vpack.c.bf16 %v856_v19, %v857_v25  ;;  %v2179_v10 = vld [vmem:[#allocation7 + $0x150] ss:$8 sps:$4 sm:$0xff]   ;;  %v2185_v14 = vld [vmem:[#allocation7 + $0x160] ss:$8 sps:$4 sm:$0xff]   ;;  %v2193_v17 = vld [vmem:[#allocation7 + $0x174] ss:$8 sps:$4 sm:$0xff]  }
 0x15d   : > { %1951 = vmatpush3.bf16.msra.mxu1 %v2120_v15  ;;  %v2182_v12 = vld [vmem:[#allocation7 + $0xd0] ss:$8 sps:$4 sm:$0xff]   ;;  %v2190_v15 = vld [vmem:[#allocation7 + $0xe4] ss:$8 sps:$4 sm:$0xff]   ;;  %v2188_v16 = vld [vmem:[#allocation7 + $0xe0] ss:$8 sps:$4 sm:$0xff]  }
 0x15e   : > { %1114 = vmatmul.mubr.bf16.vlgmr.msra.gmra.mrb[4].mxu0 %v864_v27  ;;  %1960 = vmatprep.mubr.bf16.mxu1 %v881_v28  ;;  %v2191_v18 = vld [vmem:[#allocation7 + $0x170] ss:$8 sps:$4 sm:$0xff]   ;;  %v2196_v19 = vld [vmem:[#allocation7 + $0xf4] ss:$8 sps:$4 sm:$0xff]  }
 0x15f   : > { %1121 = vmatprep.mubr.bf16.mxu0 %v867_v9  ;;  %1952 = vmatprep.subr.bf16.mxu1 %v2121_v29  ;;  %v2181_v9 = vld [vmem:[#allocation7 + $0x154] ss:$8 sps:$4 sm:$0xff]   ;;  %v2194_v20 = vld [vmem:[#allocation7 + $0xf0] ss:$8 sps:$4 sm:$0xff]  }
 0x160   : > { %1536 = vmatpush1.bf16.msra.mxu0 %v2125_v31 }
 0x161   : > { %1537 = vmatprep.subr.bf16.mxu0 %v2130_v32  ;;  %1953 = vmatpush3.bf16.msra.mxu1 %v2121_v29 }
 0x162   : > { %1954 = vmatprep.subr.bf16.mxu1 %v2122_v33 }
 0x164   : > { %1538 = vmatpush1.bf16.msra.mxu0 %v2128_v34 }
 0x165   : > { %1539 = vmatprep.subr.bf16.mxu0 %v2133_v35  ;;  %1955 = vmatpush3.bf16.msra.mxu1 %v2122_v33 }
 0x166   : > { %1122 = vmatmul.mubr.bf16.gmra.mrb[8].mxu0 %v865_v30  ;;  %1956 = vmatprep.subr.bf16.mxu1 %v2123_v36 }
 0x168   : > { %1540 = vmatpush1.bf16.msra.mxu0 %v2131_v37 }
 0x169   : > { %1541 = vmatprep.subr.bf16.mxu0 %v2136_v38  ;;  %1957 = vmatpush3.bf16.msra.mxu1 %v2123_v36 }
 0x16a   : > { %1958 = vmatprep.subr.bf16.mxu1 %v2124_v39 }
 0x16c   : > { %1542 = vmatpush1.bf16.msra.mxu0 %v2134_v40 }
 0x16d   : > { %1959 = vmatpush3.bf16.msra.mxu1 %v2124_v39  ;;  %1543 = vmatprep.subr.bf16.mxu0 %v2139_v41  ;;  %v1805_v41 = vld [vmem:[%s2755_s10] ss:$0 sm:$0xff] }
 0x16e   : > { %1588 = vmatprep.subr.bf16.mxu1 %v2151_v51  ;;  %v1831_v51 = vld [vmem:[%s2753_s8] ss:$0 sm:$0xff] }
 0x170   : > { %1961 = vmatmul.mubr.bf16.vlgmr.msra.gmra.mrb[12].mxu1 %v882_v26  ;;  %1544 = vmatpush1.bf16.msra.mxu0 %v2137_v43 }
 0x171   : > { %1620 = vmatprep.mubr.bf16.mxu1 %v2361_v42  ;;  %1545 = vmatprep.subr.bf16.mxu0 %v2142_v45  ;;  %v1830_v45 = vld [vmem:[%s2752_s7] ss:$0 sm:$0xff] }
 0x172   : > { %1589 = vmatpush1.bf16.msra.mxu1 %v2149_v52 }
 0x173   : > { %1590 = vmatprep.subr.bf16.mxu1 %v2157_v55 }
 0x174   : > { %1546 = vmatpush1.bf16.msra.mxu0 %v2140_v44 }
 0x175   : > { %1547 = vmatprep.subr.bf16.mxu0 %v2145_v46 }
 0x176   : > { %1591 = vmatpush1.bf16.msra.mxu1 %v2155_v56 }
 0x177   : > { %1592 = vmatprep.subr.bf16.mxu1 %v2163_v59 }
 0x178   : > { %1548 = vmatpush1.bf16.msra.mxu0 %v2143_v47 }
 0x179   : > { %1549 = vmatprep.subr.bf16.mxu0 %v2148_v48 }
 0x17a   : > { %1593 = vmatpush1.bf16.msra.mxu1 %v2161_v60 }
 0x17b   : > { %1594 = vmatprep.subr.bf16.mxu1 %v2169_v63 }
 0x17c   : > { %1550 = vmatpush1.bf16.msra.mxu0 %v2146_v49 }
 0x17d   : > { %1551 = vmatprep.subr.bf16.mxu0 %v2154_v54 }
 0x17e   : > { %1595 = vmatpush1.bf16.msra.mxu1 %v2167_v0 }
 0x17f   : > { %1596 = vmatprep.subr.bf16.mxu1 %v2175_v3 }
 0x180   : > { %1552 = vmatpush1.bf16.msra.mxu0 %v2152_v53 }
 0x181   : > { %1553 = vmatprep.subr.bf16.mxu0 %v2160_v57 }
 0x182   : > { %1597 = vmatpush1.bf16.msra.mxu1 %v2173_v4 }
 0x183   : > { %1598 = vmatprep.subr.bf16.mxu1 %v2181_v9 }
 0x184   : > { %1554 = vmatpush1.bf16.msra.mxu0 %v2158_v58 }
 0x185   : > { %1555 = vmatprep.subr.bf16.mxu0 %v2166_v62 }
 0x186   : > { %1599 = vmatpush1.bf16.msra.mxu1 %v2179_v10 }
 0x187   : > { %1600 = vmatprep.subr.bf16.mxu1 %v2187_v13 }
 0x188   : > { %1556 = vmatpush1.bf16.msra.mxu0 %v2164_v61 }
 0x189   : > { %1557 = vmatprep.subr.bf16.mxu0 %v2172_v1 }
 0x18a   : > { %1601 = vmatpush1.bf16.msra.mxu1 %v2185_v14 }
 0x18b   : > { %1602 = vmatprep.subr.bf16.mxu1 %v2193_v17 }
 0x18c   : > { %1558 = vmatpush1.bf16.msra.mxu0 %v2170_v2 }
 0x18d   : > { %1559 = vmatprep.subr.bf16.mxu0 %v2178_v6 }
 0x18e   : > { %1603 = vmatpush1.bf16.msra.mxu1 %v2191_v18 }
 0x190   : > { %1560 = vmatpush1.bf16.msra.mxu0 %v2176_v8 }
 0x191   : > { %1561 = vmatprep.subr.bf16.mxu0 %v2184_v11 }
 0x194   : > { %1562 = vmatpush1.bf16.msra.mxu0 %v2182_v12 }
 0x195   : > { %1563 = vmatprep.subr.bf16.mxu0 %v2190_v15 }
 0x198   : > { %1564 = vmatpush1.bf16.msra.mxu0 %v2188_v16 }
 0x199   : > { %1565 = vmatprep.subr.bf16.mxu0 %v2196_v19 }
 0x19c   : > { %1566 = vmatpush1.bf16.msra.mxu0 %v2194_v20 }
 0x223   : > { %v2620_v21 = vpop.f32.mrb[4].mxu1 }
 0x224   : > { %v2622_v22 = vpop.f32.mrb[5].mxu1 }
 0x225   : > { %v2624_v23 = vpop.f32.mrb[6].mxu1 }
 0x226   : > { %v2626_v24 = vpop.f32.mrb[7].mxu1 }
 0x22b   : > { %v2628_v25 = vpop.f32.mrb[8].mxu1 }
 0x22c   : > { %v2630_v26 = vpop.f32.mrb[9].mxu1 }
 0x22d   : > { %v2632_v27 = vpop.f32.mrb[10].mxu1 }
 0x22e   : > { %v2634_v28 = vpop.f32.mrb[11].mxu1 }
 0x231   : > { %v1910_v29 = vpop.f32.mrb[4].mxu0 }
 0x232   : > { %v1911_v30 = vpop.f32.mrb[5].mxu0 }
 0x233   : > { %v1912_v31 = vadd.f32 %v1911_v30, %v1910_v29  ;;  %v1913_v32 = vpop.f32.mrb[6].mxu0 }
 0x234   : > { %v1914_v33 = vpop.f32.mrb[7].mxu0 }
 0x235   : > { %v1915_v34 = vadd.f32 %v1914_v33, %v1913_v32  ;;  %v1116_v46 = vadd.f32 %v1912_v31, %v1805_v41 }
 0x237   : > { %v1119_v54 = vadd.f32 %v1915_v34, %v1805_v41 }
 0x239   : > { %v1916_v35 = vpop.f32.mrb[8].mxu0 }
 0x23a   : > { %v1917_v36 = vpop.f32.mrb[9].mxu0 }
 0x23b   : > { %v1918_v37 = vadd.f32 %v1917_v36, %v1916_v35  ;;  %v1919_v38 = vpop.f32.mrb[10].mxu0 }
 0x23c   : > { %v1920_v39 = vpop.f32.mrb[11].mxu0 }
 0x23d   : > { %v1921_v40 = vadd.f32 %v1920_v39, %v1919_v38  ;;  %v1124_v43 = vadd.f32 %v1918_v37, %v1805_v41 }
 0x23f   : > { %v1127_v49 = vadd.f32 %v1921_v40, %v1805_v41  ;;  %v641_v40 = vsub.s32 1, %v2590_v50 }
 0x243   : > { %v1962_v44 = vpop.f32.mrb[12].mxu1 }
 0x244   : > { %v1173_v47 = vadd.f32 %v1962_v44, %v1124_v43  ;;  %v1164_v48 = vpop.f32.mrb[13].mxu1  ;;  %v1205_v44 = vld [vmem:[%s2756_s11] sm:$0x3] }
 0x245   : > { %v1165_v52 = vadd.f32 %v1164_v48, %v1116_v46  ;;  %v1963_v53 = vpop.f32.mrb[14].mxu1 }
 0x246   : > { %v1188_v55 = vmul.f32 %v1830_v45, %v1173_v47  ;;  %v1176_v56 = vadd.f32 %v1963_v53, %v1127_v49  ;;  %v1167_v57 = vpop.f32.mrb[15].mxu1  ;;  %v1292_v47 = vrot.slane %v1205_v44, %v641_v40 }
 0x247   : > { %v1186_v58 = vmul.f32 %v1830_v45, %v1165_v52  ;;  %v1168_v59 = vadd.f32 %v1167_v57, %v1119_v54 }
 0x248   : > { %v1199_v60 = vadd.f32 %v1831_v51, %v1188_v55  ;;  %v1189_v61 = vmul.f32 %v1830_v45, %v1176_v56 }
 0x249   : > { %v1197_v62 = vadd.f32 %v1831_v51, %v1186_v58  ;;  %v1187_v63 = vmul.f32 %v1830_v45, %v1168_v59 }
 0x24a   : > { %v1203_v0 = vmax.f32 %v1199_v60, 0.0  ;;  %v1200_v1 = vadd.f32 %v1831_v51, %v1189_v61 }
 0x24b   : > { %v1201_v2 = vmax.f32 %v1197_v62, 0.0  ;;  %v1198_v3 = vadd.f32 %v1831_v51, %v1187_v63 }
 0x24c   : > { %v1204_v4 = vmax.f32 %v1200_v1, 0.0  ;;  %v1224_v6 = vrot.slane %v1203_v0, 1  ;;  %v1208_v14 = vrot.slane %v1203_v0, 7 }
 0x24d   : > { %v1206_v8 = vrot.slane %v1201_v2, 7  ;;  %v1222_v9 = vrot.slane %v1201_v2, 1  ;;  %v1202_v10 = vmax.f32 %v1198_v3, 0.0 }
 0x24e   : > { %v1209_v11 = vrot.slane %v1204_v4, 7  ;;  %v1221_v12 = vpack.c.bf16 %v1204_v4, %v1203_v0  ;;  %v1225_v13 = vrot.slane %v1204_v4, 1 }
 0x24f   : > { %v1207_v15 = vrot.slane %v1202_v10, 7  ;;  %v1223_v16 = vrot.slane %v1202_v10, 1  ;;  %v1220_v17 = vpack.c.bf16 %v1202_v10, %v1201_v2 }
 0x250   : > { %v1213_v18 = vsel %vm855_vm3, %v1209_v11, %v1206_v8  ;;  %v1226_v19 = vsel %vm872_vm4, %v1224_v6, %v1225_v13  ;;  %v1229_v20 = vsel %vm872_vm4, %v1225_v13, %v1222_v9  ;;  %v1210_v29 = vsel %vm855_vm3, %v1208_v14, %v1209_v11 }
 0x251   : > { %1567 = vmatprep.mubr.bf16.mxu0 %v1220_v17  ;;  %v1227_v30 = vsel %vm872_vm4, %v1223_v16, %v1224_v6  ;;  %v1228_v31 = vsel %vm872_vm4, %v1222_v9, %v1223_v16  ;;  %v1212_v32 = vsel %vm855_vm3, %v1206_v8, %v1207_v15  ;;  %v1214_v33 = vmul.f32 %v2596_v5, %v1213_v18 }
 0x252   : > { %v1234_v34 = vpack.c.bf16 %v1227_v30, %v1228_v31  ;;  %v1233_v35 = vmul.f32 %v2599_v7, %v1229_v20  ;;  %v1211_v36 = vsel %vm855_vm3, %v1207_v15, %v1208_v14  ;;  %v637_v5 = vsub.s32 0, %v2590_v50  ;;  %v633_v7 = vld [vmem:[%s2754_s9] sm:$0x3] }
 0x253   : > { %v1218_v37 = vpack.c.bf16 %v1212_v32, %v1214_v33  ;;  %v1219_v38 = vpack.c.bf16 %v1210_v29, %v1211_v36  ;;  %v642_v43 = vrot.slane %v633_v7, %v641_v40 }
 0x254   : > { %1621 = vmatmul.mubr.bf16.vlgmr.msra.gmra.mrb[16].mxu1 %v1234_v34  ;;  %v1235_v39 = vpack.c.bf16 %v1233_v35, %v1226_v19  ;;  %v638_v41 = vrot.slane %v633_v7, %v637_v5  ;;  %v1288_v45 = vrot.slane %v1205_v44, %v637_v5 }
 0x255   : > { %1568 = vmatmul.mubr.bf16.vlgmr.msra.gmra.mrb[12].mxu0 %v1218_v37  ;;  %1630 = vmatprep.mubr.bf16.mxu1 %v2361_v42  ;;  %v762_v46 = vadd.f32 %v2622_v22, %v642_v43  ;;  %v766_v49 = vadd.f32 %v2626_v24, %v642_v43  ;;  %v772_v63 = vadd.f32 %v2630_v26, %v642_v43 }
 0x256   : > { %1577 = vmatprep.mubr.bf16.mxu0 %v1221_v12  ;;  %v760_v42 = vadd.f32 %v2620_v21, %v638_v41  ;;  %v764_v48 = vadd.f32 %v2624_v23, %v638_v41  ;;  %v770_v61 = vadd.f32 %v2628_v25, %v638_v41  ;;  %v774_v2 = vadd.f32 %v2632_v27, %v638_v41 }
 0x257   : > { %v1969_v54 = vadd.f32 %v1292_v47, %v762_v46  ;;  %v1977_v60 = vadd.f32 %v1292_v47, %v766_v49  ;;  %v776_v25 = vadd.f32 %v2634_v28, %v642_v43  ;;  %v1985_v9 = vadd.f32 %v1292_v47, %v772_v63 }
 0x258   : > { %v1965_v50 = vadd.f32 %v1288_v45, %v760_v42  ;;  %v1973_v21 = vadd.f32 %v1288_v45, %v764_v48  ;;  %v1981_v26 = vadd.f32 %v1288_v45, %v770_v61  ;;  %v1989_v13 = vadd.f32 %v1288_v45, %v774_v2 }
 0x259   : > { %v1993_v16 = vadd.f32 %v1292_v47, %v776_v25 }
 0x25c   : > { %1631 = vmatmul.mubr.bf16.gmra.mrb[20].mxu1 %v1235_v39 }
 0x25d   : > { %1578 = vmatmul.mubr.bf16.gmra.mrb[16].mxu0 %v1219_v38 }
 0x327   : > { %v1622_v51 = vpop.f32.mrb[16].mxu1 }
 0x328   : > { %v1569_v52 = vpop.f32.mrb[12].mxu0  ;;  %v1624_v53 = vpop.f32.mrb[17].mxu1 }
 0x329   : > { %v1966_v55 = vadd.f32 %v1965_v50, %v1569_v52  ;;  %v1571_v56 = vpop.f32.mrb[13].mxu0  ;;  %v1626_v57 = vpop.f32.mrb[18].mxu1 }
 0x32a   : > { %v1970_v58 = vadd.f32 %v1969_v54, %v1571_v56  ;;  %v1573_v59 = vpop.f32.mrb[14].mxu0  ;;  %v1628_v22 = vpop.f32.mrb[19].mxu1 }
 0x32b   : > { %v1967_v23 = vadd.f32 %v1966_v55, %v1622_v51  ;;  %v1974_v62 = vadd.f32 %v1973_v21, %v1573_v59  ;;  %v1575_v24 = vpop.f32.mrb[15].mxu0 }
 0x32c   : > { %v1971_v0 = vadd.f32 %v1970_v58, %v1624_v53  ;;  %v1978_v1 = vadd.f32 %v1977_v60, %v1575_v24 }
 0x32d   : > { %1649 = vst [vmem:[%s2682_s27] sm:$0xff] %v1967_v23  ;;  %v1975_v3 = vadd.f32 %v1974_v62, %v1626_v57 }
 0x32e   : > { %1650 = vst [vmem:[%s2682_s27 + $0x8] sm:$0xff] %v1971_v0  ;;  %v1979_v4 = vadd.f32 %v1978_v1, %v1628_v22 }
 0x32f   : > { %1651 = vst [vmem:[%s2682_s27 + $0x10] sm:$0xff] %v1975_v3  ;;  %v1632_v6 = vpop.f32.mrb[20].mxu1 }
 0x330   : > { %1652 = vst [vmem:[%s2682_s27 + $0x18] sm:$0xff] %v1979_v4  ;;  %v1579_v8 = vpop.f32.mrb[16].mxu0  ;;  %v1634_v27 = vpop.f32.mrb[21].mxu1 }
 0x331   : > { %v1982_v10 = vadd.f32 %v1981_v26, %v1579_v8  ;;  %v1581_v11 = vpop.f32.mrb[17].mxu0  ;;  %v1636_v12 = vpop.f32.mrb[22].mxu1 }
 0x332   : > { %v1986_v14 = vadd.f32 %v1985_v9, %v1581_v11  ;;  %v1583_v28 = vpop.f32.mrb[18].mxu0  ;;  %v1638_v15 = vpop.f32.mrb[23].mxu1 }
 0x333   : > { %v1983_v17 = vadd.f32 %v1982_v10, %v1632_v6  ;;  %v1990_v18 = vadd.f32 %v1989_v13, %v1583_v28  ;;  %v1585_v19 = vpop.f32.mrb[19].mxu0 }
 0x334   : > { %v1987_v20 = vadd.f32 %v1986_v14, %v1634_v27  ;;  %v1994_v29 = vadd.f32 %v1993_v16, %v1585_v19 }
 0x335   : > { %1653 = vst [vmem:[%s2682_s27 + $0x20] sm:$0xff] %v1983_v17  ;;  %v1991_v30 = vadd.f32 %v1990_v18, %v1636_v12 }
 0x336   : > { %1654 = vst [vmem:[%s2682_s27 + $0x28] sm:$0xff] %v1987_v20  ;;  %v1995_v31 = vadd.f32 %v1994_v29, %v1638_v15 }
 0x337   : > { %1655 = vst [vmem:[%s2682_s27 + $0x30] sm:$0xff] %v1991_v30 }
 0x338   : > { %1656 = vst [vmem:[%s2682_s27 + $0x38] sm:$0xff] %v1995_v31 }
 0x339   : > { %2295 = shalt.err (!%p2292_p11)
}
 0x33a   : > { %s2296_s16 = scalar_lea.hbm %s2698_s20, 1024  ;;  %s2300_s12 = scalar_lea.hbm %s2787_s17, 2048 }
 0x33b   : > { %p2297_p13 = scmp.ne.s32.totalorder %s2698_s20, %s2296_s16  ;;  %p2301_p6 = scmp.lt.u32.totalorder %s2698_s20, %s2787_s17 }
 0x33c   : > { %p2302_p9 = scmp.lt.u32.totalorder %s2300_s12, %s2296_s16  ;;  %p2304_p12 = scmp.lt.u32.totalorder %s2296_s16, %s2698_s20 }
 0x33d   : > { %p2298_p5 = pnand %p2297_p13, %p2788_p1 }
 0x33e   : > { %p2303_p10 = por %p2302_p9, %p2301_p6 }
 0x33f   : > { %p2299_p0 = pneg %p2298_p5 }
 0x340   : > { %p2305_p2 = por %p2304_p12, %p2303_p10 }
 0x342   : > { %p2306_p3 = pnand %p2305_p2, %p2299_p0 }
 0x344   : > { %2309 = shalt.err (!%p2306_p3)
}
 0x345   : > { %s2364_s27 = smov 256   ;;  %s2365_s29 = smov 16  }
 0x346   : > { %2008 = dma.vmem_to_hbm [thread:$0]  (%p2788_p1), %s2691_s28, 1024, %s2698_s20, %s2704_s25, %s2364_s27, %s2364_s27, %s2365_s29  }
 0x347 PF: > { %s2789_s19 = sld [smem:[#allocation14_spill]]  ;;  %s2790_s26 = sld [smem:[#allocation12_spill]] }
 0x348   : > { %s2791_s24 = sld [smem:[#allocation17_spill]] }
 0x34d   : > { %p2030_p4 = scmp.ge.s32.totalorder %s2789_s19, 2  ;;  %s1687_s14 = sand.u32 1, %s2790_s26  }
 0x34e   : > { %p2792_p7 = scmp.ne.s32.totalorder %s2791_s24, 0  ;;  %s1688_s3 = scalar_lea.sflag [#allocation4], %s1687_s14 }
 0x350   : > { %p2021_p8 = pnand %p2030_p4, %p2792_p7 }
 0x352   : > { %2335 = dma.done.wait (!%p2021_p8), %s1688_s3, 1024  }
 0x353   : > { %2337 = vsyncadd (!%p2021_p8), %s1688_s3, 4294966272  ;;  %s2793_s24 = sld [smem:[#allocation15_spill]]  ;;  %s2794_s18 = sld [smem:[#allocation13_spill]] }
 0x354   : > { %s2795_s23 = sld [smem:[#allocation16_spill]]  ;;  %s2796_s21 = smov %s2344_s22 }
 0x359   : > { %p24_p11 = scmp.ge.s32.totalorder %s2793_s24, 4   ;;  %s2797_s22 = smov %s2794_s18 }
 0x35b   :  { %26 = sbr.rel (!%p24_p11) target bundleno = 8 (0x8), region = 116 }
 0x362   :  { %1693 = vsyncpa [#allocation3], 1 }
 0x363   :  { %1695 = vsyncpa [#allocation3 + $0x1], 1 }
 0x364   :  { %1696 = vsyncpa [#allocation6], 1 }
 0x365   :  { %1697 = vsyncpa [#allocation4], 1 }
 0x366   :  { %1699 = vsyncpa [#allocation4 + $0x1], 1 }

</bundles_post_ra>
